<compile_context>
chip_gen: v6e
topology: v6e:2x2x1
jax: 0.10.0
libtpu: 0.0.40
codegen_flags: <defaults>
</compile_context>

<pallas_src>
import functools

import jax
import jax.numpy as jnp
from jax.experimental import pallas as pl
from jax.experimental.pallas import tpu as pltpu


def _round_up(x, m):
    return (x + m - 1) // m * m


_SQRT_2_OVER_PI = 0.7978845608028654


def _gelu_tanh(y):
    # tanh-approximate GELU; the tanh goes to the EUP slot (free under MXU).
    # TODO(synk): PyTorch nn.GELU() default is exact-erf GELU; the tanh
    # approximation differs by ~1e-3 absolute (acceptable for fp32 tolerance).
    return 0.5 * y * (1.0 + jnp.tanh(_SQRT_2_OVER_PI * (y + 0.044715 * y * y * y)))


# ----------------------------- Pallas kernel --------------------------------

def _ff_fused_kernel(x_ref, w1_ref, b1_ref, w2_ref, b2_ref, o_ref, acc_ref):
    """One grid step: rows tile i, hidden tile h.

    out[i] = sum_h GELU(x[i] @ W1[:, h] + b1[h]) @ W2[h, :]  (+ b2 at the end)
    """
    h_idx = pl.program_id(1)

    @pl.when(h_idx == 0)
    def _():
        acc_ref[...] = jnp.zeros_like(acc_ref)

    # (tm, D) @ (D, th) -> (tm, th) on the MXU with f32 accumulation.
    h = jnp.dot(x_ref[...], w1_ref[...], preferred_element_type=jnp.float32)
    h = _gelu_tanh(h + b1_ref[...].astype(jnp.float32))

    # (tm, th) @ (th, D) -> (tm, D); accumulate across hidden tiles.
    acc_ref[...] += jnp.dot(h.astype(w2_ref.dtype), w2_ref[...],
                            preferred_element_type=jnp.float32)

    @pl.when(h_idx == pl.num_programs(1) - 1)
    def _():
        o_ref[...] = (acc_ref[...] + b2_ref[...].astype(jnp.float32)).astype(o_ref.dtype)


# ----------------------------- wrapper ---------------------------------------

def pallas_feedforward(x2d, w1, b1, w2, b2, *, tm=256, th=512,
                       out_dtype=None, vmem_budget_bytes=24 * 1024 * 1024):
    """y = GELU(x2d @ w1 + b1) @ w2 + b2, fused in one pallas_call."""
    M, D = x2d.shape
    Dw, H = w1.shape
    assert Dw == D and w2.shape == (H, D) and b1.shape == (H,) and b2.shape == (D,)
    out_dtype = jnp.dtype(out_dtype or x2d.dtype)

    # Matmul operands in the weight dtype (bf16) — MXU-native on v5e/v6e/v7x.
    x2d = x2d.astype(w1.dtype)

    # Pad to TPU tiling: rows -> multiple of 8 (sublane), features -> 128 (lane).
    Mp = _round_up(M, 8)
    Dp = _round_up(D, 128)
    Hp = _round_up(H, 128)

    tm = max(8, min(tm, Mp))
    th = max(128, min(th, Hp))

    # Crude VMEM sizing (double-buffered inputs + f32 accumulator + output),
    # targeted well inside v7x's 64 MiB VMEM.
    ibytes = jnp.dtype(w1.dtype).itemsize

    def est(tm_, th_):
        per_step = (tm_ * Dp + Dp * th_ + th_ + th_ * Dp + Dp) * ibytes
        return 2 * per_step + tm_ * Dp * (4 + out_dtype.itemsize)

    while est(tm, th) > vmem_budget_bytes and th > 128:
        th //= 2
    while est(tm, th) > vmem_budget_bytes and tm > 8:
        tm //= 2

    Mp = _round_up(Mp, tm)
    Hp = _round_up(Hp, th)

    # Zero padding is exact: padded K-columns contribute 0, padded hidden
    # columns give GELU(0)=0 (and W2's padded rows are 0), padded output
    # columns are sliced off below.
    xp = jnp.pad(x2d, ((0, Mp - M), (0, Dp - D)))
    w1p = jnp.pad(w1, ((0, Dp - D), (0, Hp - H)))
    b1p = jnp.pad(b1, (0, Hp - H)).reshape(1, Hp)
    w2p = jnp.pad(w2, ((0, Hp - H), (0, Dp - D)))
    b2p = jnp.pad(b2, (0, Dp - D)).reshape(1, Dp)

    grid = (Mp // tm, Hp // th)

    out = pl.pallas_call(
        _ff_fused_kernel,
        grid=grid,
        out_shape=jax.ShapeDtypeStruct((Mp, Dp), out_dtype),
        in_specs=[
            pl.BlockSpec((tm, Dp), lambda i, h: (i, 0)),   # x row tile
            pl.BlockSpec((Dp, th), lambda i, h: (0, h)),   # W1 column tile
            pl.BlockSpec((1, th), lambda i, h: (0, h)),    # b1 tile
            pl.BlockSpec((th, Dp), lambda i, h: (h, 0)),   # W2 row tile
            pl.BlockSpec((1, Dp), lambda i, h: (0, 0)),    # b2
        ],
        out_specs=pl.BlockSpec((tm, Dp), lambda i, h: (i, 0)),
        scratch_shapes=[pltpu.VMEM((tm, Dp), jnp.float32)],
        compiler_params=pltpu.CompilerParams(
            dimension_semantics=("parallel", "arbitrary")),
    )(xp, w1p, b1p, w2p, b2p)

    return out[:M, :D]


def feedforward_multiframe_forward(params, x):
    """FeedForward_Multiframe.forward: Linear -> GELU -> Dropout -> Linear -> Dropout.

    Dropout is the identity in eval mode / p=0.0.
    """
    lead, D = x.shape[:-1], x.shape[-1]
    y = pallas_feedforward(x.reshape(-1, D),
                           params["w1"], params["b1"],
                           params["w2"], params["b2"],
                           out_dtype=x.dtype)
    return y.reshape(*lead, D)


# ----------------------------- parameter init --------------------------------

def init_params(key, dim, hidden_dim, dtype=jnp.bfloat16):
    # PyTorch nn.Linear init style: U(-1/sqrt(fan_in), 1/sqrt(fan_in)).
    k1, k2, k3, k4 = jax.random.split(key, 4)
    s1 = 1.0 / (dim ** 0.5)
    s2 = 1.0 / (hidden_dim ** 0.5)
    return {
        # weights stored transposed relative to PyTorch: (in, out)
        "w1": jax.random.uniform(k1, (dim, hidden_dim), jnp.float32, -s1, s1).astype(dtype),
        "b1": jax.random.uniform(k2, (hidden_dim,), jnp.float32, -s1, s1).astype(dtype),
        "w2": jax.random.uniform(k3, (hidden_dim, dim), jnp.float32, -s2, s2).astype(dtype),
        "b2": jax.random.uniform(k4, (dim,), jnp.float32, -s2, s2).astype(dtype),
    }


# ----------------------------- main ------------------------------------------

if __name__ == "__main__":
    B, N, dim, hidden_dim = 2, 8, 32, 64     # x: (batch, tokens, dim)

    key = jax.random.PRNGKey(0)
    pkey, xkey = jax.random.split(key)
    params = init_params(pkey, dim, hidden_dim)
    x = jax.random.normal(xkey, (B, N, dim), dtype=jnp.float32)

    fwd = jax.jit(feedforward_multiframe_forward)
    y = fwd(params, x)
    jax.block_until_ready(y)
    assert y.shape == (B, N, dim)

    # Plain-JAX reference with the same bf16 operand rounding as the kernel.
    xf = x.reshape(-1, dim).astype(jnp.bfloat16).astype(jnp.float32)
    w1f = params["w1"].astype(jnp.float32)
    b1f = params["b1"].astype(jnp.float32)
    w2f = params["w2"].astype(jnp.float32)
    b2f = params["b2"].astype(jnp.float32)
    h_ref = _gelu_tanh(xf @ w1f + b1f).astype(jnp.bfloat16).astype(jnp.float32)
    ref = (h_ref @ w2f + b2f).reshape(B, N, dim)

    err = float(jnp.max(jnp.abs(y - ref)))
    assert jnp.allclose(y, ref, atol=2e-2, rtol=2e-2), f"max abs err {err}"
    print("KERNEL_OK")
</pallas_src>

<mosaic_0001>
module attributes {stable_mosaic.version = 11 : i64} {
  func.func @_ff_fused_kernel(%arg0: i32, %arg1: i32, %arg2: memref<16x128xbf16, #tpu.memory_space<vmem>>, %arg3: memref<128x128xbf16, #tpu.memory_space<vmem>>, %arg4: memref<1x128xbf16, #tpu.memory_space<vmem>>, %arg5: memref<128x128xbf16, #tpu.memory_space<vmem>>, %arg6: memref<1x128xbf16, #tpu.memory_space<vmem>>, %arg7: memref<16x128xf32, #tpu.memory_space<vmem>>, %arg8: memref<16x128xf32, #tpu.memory_space<vmem>>) attributes {dimension_semantics = [#tpu.dimension_semantics<parallel>, #tpu.dimension_semantics<arbitrary>], iteration_bounds = array<i64: 1, 1>, scalar_prefetch = 0 : i64, scratch_operands = 1 : i64, tpu.core_type = #tpu.core_type<tc>, window_params = [{transform_indices = @transform_0, window_bounds = array<i64: 16, 128>}, {transform_indices = @transform_1, window_bounds = array<i64: 128, 128>}, {transform_indices = @transform_2, window_bounds = array<i64: 1, 128>}, {transform_indices = @transform_3, window_bounds = array<i64: 128, 128>}, {pipeline_mode = #tpu.pipeline_mode<synchronous>, transform_indices = @transform_4, window_bounds = array<i64: 1, 128>}, {transform_indices = @transform_5, window_bounds = array<i64: 16, 128>}]} {
    %c0_i32 = arith.constant 0 : i32
    %0 = arith.cmpi eq, %arg1, %c0_i32 : i32
    %1 = arith.extui %0 : i1 to i32
    %c0_i32_0 = arith.constant 0 : i32
    %2 = arith.cmpi ne, %1, %c0_i32_0 : i32
    scf.if %2 {
      %cst_19 = arith.constant 0.000000e+00 : f32
      %32 = vector.broadcast %cst_19 : f32 to vector<16x128xf32>
      %c0_20 = arith.constant 0 : index
      %c0_21 = arith.constant 0 : index
      %33 = vector.load %arg8[%c0_20, %c0_21] : memref<16x128xf32, #tpu.memory_space<vmem>>, vector<16x128xf32>
      tpu.vector_store %arg8[%c0_20, %c0_21], %32 {strides = array<i32>} : memref<16x128xf32, #tpu.memory_space<vmem>>, vector<16x128xf32>,
    } else {
    }
    %c0 = arith.constant 0 : index
    %c0_1 = arith.constant 0 : index
    %3 = vector.load %arg2[%c0, %c0_1] : memref<16x128xbf16, #tpu.memory_space<vmem>>, vector<16x128xbf16>
    %c0_2 = arith.constant 0 : index
    %c0_3 = arith.constant 0 : index
    %4 = vector.load %arg3[%c0_2, %c0_3] : memref<128x128xbf16, #tpu.memory_space<vmem>>, vector<128x128xbf16>
    %cst = arith.constant dense<0.000000e+00> : vector<16x128xf32>
    %5 = tpu.matmul %3, %4, %cst {dimension_numbers = #tpu.dot_dimension_numbers<[1], [0], [0], [1], [0, 0, 1, 1], [], []>} : vector<16x128xbf16>, vector<128x128xbf16>, vector<16x128xf32> -> vector<16x128xf32>
    %c0_4 = arith.constant 0 : index
    %c0_5 = arith.constant 0 : index
    %6 = vector.load %arg4[%c0_4, %c0_5] : memref<1x128xbf16, #tpu.memory_space<vmem>>, vector<1x128xbf16>
    %7 = arith.extf %6 : vector<1x128xbf16> to vector<1x128xf32>
    %8 = vector.broadcast %7 : vector<1x128xf32> to vector<16x128xf32>
    %9 = arith.addf %5, %8 : vector<16x128xf32>
    %cst_6 = arith.constant 5.000000e-01 : f32
    %10 = vector.broadcast %cst_6 : f32 to vector<16x128xf32>
    %11 = arith.mulf %10, %9 : vector<16x128xf32>
    %cst_7 = arith.constant 4.471500e-02 : f32
    %12 = vector.broadcast %cst_7 : f32 to vector<16x128xf32>
    %13 = arith.mulf %12, %9 : vector<16x128xf32>
    %14 = arith.mulf %13, %9 : vector<16x128xf32>
    %15 = arith.mulf %14, %9 : vector<16x128xf32>
    %16 = arith.addf %9, %15 : vector<16x128xf32>
    %cst_8 = arith.constant 0.797884583 : f32
    %17 = vector.broadcast %cst_8 : f32 to vector<16x128xf32>
    %18 = arith.mulf %17, %16 : vector<16x128xf32>
    %19 = math.tanh %18 : vector<16x128xf32>
    %cst_9 = arith.constant 1.000000e+00 : f32
    %20 = vector.broadcast %cst_9 : f32 to vector<16x128xf32>
    %21 = arith.addf %20, %19 : vector<16x128xf32>
    %22 = arith.mulf %11, %21 : vector<16x128xf32>
    %c0_10 = arith.constant 0 : index
    %c0_11 = arith.constant 0 : index
    %23 = vector.load %arg8[%c0_10, %c0_11] : memref<16x128xf32, #tpu.memory_space<vmem>>, vector<16x128xf32>
    %24 = arith.truncf %22 : vector<16x128xf32> to vector<16x128xbf16>
    %c0_12 = arith.constant 0 : index
    %c0_13 = arith.constant 0 : index
    %25 = vector.load %arg5[%c0_12, %c0_13] : memref<128x128xbf16, #tpu.memory_space<vmem>>, vector<128x128xbf16>
    %cst_14 = arith.constant dense<0.000000e+00> : vector<16x128xf32>
    %26 = tpu.matmul %24, %25, %cst_14 {dimension_numbers = #tpu.dot_dimension_numbers<[1], [0], [0], [1], [0, 0, 1, 1], [], []>} : vector<16x128xbf16>, vector<128x128xbf16>, vector<16x128xf32> -> vector<16x128xf32>
    %27 = arith.addf %23, %26 : vector<16x128xf32>
    %c0_15 = arith.constant 0 : index
    %c0_16 = arith.constant 0 : index
    %28 = vector.load %arg8[%c0_15, %c0_16] : memref<16x128xf32, #tpu.memory_space<vmem>>, vector<16x128xf32>
    tpu.vector_store %arg8[%c0_15, %c0_16], %27 {strides = array<i32>} : memref<16x128xf32, #tpu.memory_space<vmem>>, vector<16x128xf32>,
    %c0_i32_17 = arith.constant 0 : i32
    %29 = arith.cmpi eq, %arg1, %c0_i32_17 : i32
    %30 = arith.extui %29 : i1 to i32
    %c0_i32_18 = arith.constant 0 : i32
    %31 = arith.cmpi ne, %30, %c0_i32_18 : i32
    scf.if %31 {
      %c0_19 = arith.constant 0 : index
      %c0_20 = arith.constant 0 : index
      %32 = vector.load %arg8[%c0_19, %c0_20] : memref<16x128xf32, #tpu.memory_space<vmem>>, vector<16x128xf32>
      %c0_21 = arith.constant 0 : index
      %c0_22 = arith.constant 0 : index
      %33 = vector.load %arg6[%c0_21, %c0_22] : memref<1x128xbf16, #tpu.memory_space<vmem>>, vector<1x128xbf16>
      %34 = arith.extf %33 : vector<1x128xbf16> to vector<1x128xf32>
      %35 = vector.broadcast %34 : vector<1x128xf32> to vector<16x128xf32>
      %36 = arith.addf %32, %35 : vector<16x128xf32>
      %c0_23 = arith.constant 0 : index
      %c0_24 = arith.constant 0 : index
      %37 = vector.load %arg7[%c0_23, %c0_24] : memref<16x128xf32, #tpu.memory_space<vmem>>, vector<16x128xf32>
      tpu.vector_store %arg7[%c0_23, %c0_24], %36 {strides = array<i32>} : memref<16x128xf32, #tpu.memory_space<vmem>>, vector<16x128xf32>,
    } else {
    }
    return
  }
  func.func @transform_0(%arg0: i32, %arg1: i32) -> (i32, i32) {
    %c0_i32 = arith.constant 0 : i32
    %c0_i32_0 = arith.constant 0 : i32
    return %arg0, %c0_i32 : i32, i32
  }
  func.func @transform_1(%arg0: i32, %arg1: i32) -> (i32, i32) {
    %c0_i32 = arith.constant 0 : i32
    %c0_i32_0 = arith.constant 0 : i32
    return %c0_i32, %arg1 : i32, i32
  }
  func.func @transform_2(%arg0: i32, %arg1: i32) -> (i32, i32) {
    %c0_i32 = arith.constant 0 : i32
    %c0_i32_0 = arith.constant 0 : i32
    return %c0_i32, %arg1 : i32, i32
  }
  func.func @transform_3(%arg0: i32, %arg1: i32) -> (i32, i32) {
    %c0_i32 = arith.constant 0 : i32
    %c0_i32_0 = arith.constant 0 : i32
    return %arg1, %c0_i32 : i32, i32
  }
  func.func @transform_4(%arg0: i32, %arg1: i32) -> (i32, i32) {
    %c0_i32 = arith.constant 0 : i32
    %c0_i32_0 = arith.constant 0 : i32
    %c0_i32_1 = arith.constant 0 : i32
    return %c0_i32, %c0_i32_0 : i32, i32
  }
  func.func @transform_5(%arg0: i32, %arg1: i32) -> (i32, i32) {
    %c0_i32 = arith.constant 0 : i32
    %c0_i32_0 = arith.constant 0 : i32
    return %arg0, %c0_i32 : i32, i32
  }
}

</mosaic_0001>

<bundles_post_ra>
// kernel: feedforward_multiframe_forward.1
= control target key start
LH: loop header
LB: loop body
LE: loop exit
PB: predicated region body
PF: predicated region fallthrough
CT: control target
= control target key end

     0   :  { %v393_v0 = vmov 0.0   ;;  %vm394_vm0 = vmmov 0   ;;  %v47_v18 = vlaneseq  ;;  %s488_s1 = inlined_call_operand.vmem [shape: bf16[128,128], index: 1, kind: input, shape index: {}]   ;;  %s489_s0 = inlined_call_operand.vmem [shape: bf16[16,128], index: 0, kind: input, shape index: {}]   ;;  %s490_s3 = inlined_call_operand.vmem [shape: bf16[128,128], index: 3, kind: input, shape index: {}]   ;;  %s491_s2 = inlined_call_operand.vmem [shape: bf16[1,128], index: 2, kind: input, shape index: {}]   ;;  %s492_s4 = inlined_call_operand.vmem [shape: bf16[1,128], index: 4, kind: input, shape index: {}]   ;;  %s493_s5 = inlined_call_operand.vmem [shape: f32[16,128], index: 5, kind: output, shape index: {}]  }
   0x1   :  { %330 = vmatprep.subr.bf16.mxu0 %v393_v0  ;;  %v372_v1 = vld [vmem:[%s488_s1 + $0x38] sm:$0xff]   ;;  %346 = vmatprep.mubr.msk.bf16.mxu0 %vm394_vm0, %v393_v0  ;;  %v373_v2 = vld [vmem:[%s488_s1 + $0x30] sm:$0xff]   ;;  %v374_v3 = vld [vmem:[%s488_s1 + $0x28] sm:$0xff]  }
   0x2   :  { %350 = vmatprep.subr.bf16.mxu1 %v393_v0  ;;  %366 = vmatprep.mubr.msk.bf16.mxu1 %vm394_vm0, %v393_v0  ;;  %v375_v4 = vld [vmem:[%s488_s1 + $0x20] sm:$0xff]   ;;  %v376_v5 = vld [vmem:[%s488_s1 + $0x18] sm:$0xff]   ;;  %v377_v6 = vld [vmem:[%s488_s1 + $0x10] sm:$0xff]   ;;  %v48_v19 = vshrl.u32 %v47_v18, 7 }
   0x3   :  { %331 = vmatpush3.bf16.msra.mxu0 %v372_v1  ;;  %v378_v7 = vld [vmem:[%s488_s1 + $0x8] sm:$0xff]   ;;  %v379_v8 = vld [vmem:[%s488_s1] sm:$0xff]   ;;  %v381_v10 = vld [vmem:[%s490_s3 + $0x38] sm:$0xff]  }
   0x4   :  { %332 = vmatprep.subr.bf16.mxu0 %v393_v0  ;;  %v380_v9 = vld [vmem:[%s489_s0] sm:$0xff]   ;;  %351 = vmatpush3.bf16.msra.mxu1 %v381_v10  ;;  %v382_v11 = vld [vmem:[%s490_s3 + $0x30] sm:$0xff]   ;;  %v383_v12 = vld [vmem:[%s490_s3 + $0x28] sm:$0xff]   ;;  %v49_v22 = vsub.s32 0, %v48_v19 }
   0x5   :  { %352 = vmatprep.subr.bf16.mxu1 %v393_v0  ;;  %v384_v13 = vld [vmem:[%s490_s3 + $0x20] sm:$0xff]   ;;  %v385_v14 = vld [vmem:[%s490_s3 + $0x18] sm:$0xff]   ;;  %v386_v15 = vld [vmem:[%s490_s3 + $0x10] sm:$0xff]  }
   0x6   :  { %v387_v16 = vld [vmem:[%s490_s3 + $0x8] sm:$0xff]   ;;  %v388_v17 = vld [vmem:[%s490_s3] sm:$0xff]  }
   0x7   :  { %333 = vmatpush3.bf16.msra.mxu0 %v373_v2  ;;  %v45_v20 = vld [vmem:[%s491_s2] sm:$0x1] }
   0x8   :  { %334 = vmatprep.subr.bf16.mxu0 %v393_v0  ;;  %353 = vmatpush3.bf16.msra.mxu1 %v382_v11  ;;  %v46_v21 = vunpack.c.l.bf16 %v45_v20  ;;  %v281_v49 = vld [vmem:[%s492_s4] sm:$0x1] }
   0x9   :  { %354 = vmatprep.subr.bf16.mxu1 %v393_v0  ;;  %v282_v50 = vunpack.c.l.bf16 %v281_v49 }
   0xa   :  { %v50_v23 = vrot.slane %v46_v21, %v49_v22 }
   0xb   :  { %335 = vmatpush3.bf16.msra.mxu0 %v374_v3  ;;  %v286_v51 = vrot.slane %v282_v50, %v49_v22 }
   0xc   :  { %336 = vmatprep.subr.bf16.mxu0 %v393_v0  ;;  %355 = vmatpush3.bf16.msra.mxu1 %v383_v12 }
   0xd   :  { %356 = vmatprep.subr.bf16.mxu1 %v393_v0 }
   0xf   :  { %337 = vmatpush3.bf16.msra.mxu0 %v375_v4 }
  0x10   :  { %338 = vmatprep.subr.bf16.mxu0 %v393_v0  ;;  %357 = vmatpush3.bf16.msra.mxu1 %v384_v13 }
  0x11   :  { %358 = vmatprep.subr.bf16.mxu1 %v393_v0 }
  0x13   :  { %339 = vmatpush3.bf16.msra.mxu0 %v376_v5 }
  0x14   :  { %340 = vmatprep.subr.bf16.mxu0 %v393_v0  ;;  %359 = vmatpush3.bf16.msra.mxu1 %v385_v14 }
  0x15   :  { %360 = vmatprep.subr.bf16.mxu1 %v393_v0 }
  0x17   :  { %341 = vmatpush3.bf16.msra.mxu0 %v377_v6 }
  0x18   :  { %342 = vmatprep.subr.bf16.mxu0 %v393_v0  ;;  %361 = vmatpush3.bf16.msra.mxu1 %v386_v15 }
  0x19   :  { %362 = vmatprep.subr.bf16.mxu1 %v393_v0 }
  0x1b   :  { %343 = vmatpush3.bf16.msra.mxu0 %v378_v7 }
  0x1c   :  { %344 = vmatprep.subr.bf16.mxu0 %v393_v0  ;;  %363 = vmatpush3.bf16.msra.mxu1 %v387_v16 }
  0x1d   :  { %364 = vmatprep.subr.bf16.mxu1 %v393_v0 }
  0x1f   :  { %345 = vmatpush3.bf16.msra.mxu0 %v379_v8 }
  0x20   :  { %365 = vmatpush3.bf16.msra.mxu1 %v388_v17 }
  0x22   :  { %347 = vmatmul.mubr.bf16.vlgmr.msra.gmra.mxu0 %v380_v9 }
  0xe2   :  { %v139_v24 = vpop.f32.mrf.mxu0 }
  0xe3   :  { %v140_v25 = vadd.f32 %v139_v24, %v50_v23 }
  0xe4   :  { %v348_v26 = vpop.f32.mrf.mxu0 }
  0xe5   :  { %v148_v27 = vmul.f32 0.044715, %v140_v25  ;;  %v146_v43 = vmul.f32 0.5, %v140_v25 }
  0xe6   :  { %v142_v28 = vpop.f32.mrf.mxu0 }
  0xe7   :  { %v150_v29 = vmul.f32 %v148_v27, %v140_v25  ;;  %v143_v30 = vadd.f32 %v142_v28, %v50_v23 }
  0xe8   :  { %v349_v31 = vpop.f32.mrf.mxu0 }
  0xe9   :  { %v152_v32 = vmul.f32 %v150_v29, %v140_v25  ;;  %v149_v33 = vmul.f32 0.044715, %v143_v30  ;;  %v147_v44 = vmul.f32 0.5, %v143_v30 }
  0xeb   :  { %v151_v34 = vmul.f32 %v149_v33, %v143_v30  ;;  %v154_v35 = vadd.f32 %v152_v32, %v140_v25 }
  0xed   :  { %v153_v36 = vmul.f32 %v151_v34, %v143_v30  ;;  %v156_v37 = vmul.f32 0.7978846, %v154_v35 }
  0xef   :  { %v155_v38 = vadd.f32 %v153_v36, %v143_v30  ;;  %389 = vtanh.f32 %v156_v37 }
  0xf1   :  { %v157_v39 = vmul.f32 0.7978846, %v155_v38 }
  0xf3   :  { %391 = vtanh.f32 %v157_v39 }
  0xfc   :  { %v390_v40 = vpop.eup %389 }
  0xfd   :  { %v160_v41 = vadd.f32 1.0, %v390_v40 }
  0xff   :  { %v162_v46 = vmul.f32 %v160_v41, %v146_v43 }
 0x100   :  { %v392_v42 = vpop.eup %391 }
 0x101   :  { %v161_v45 = vadd.f32 1.0, %v392_v42 }
 0x103   :  { %v163_v47 = vmul.f32 %v161_v45, %v147_v44 }
 0x105   :  { %v166_v48 = vpack.c.bf16 %v163_v47, %v162_v46 }
 0x107   :  { %367 = vmatmul.mubr.bf16.vlgmr.msra.gmra.mxu1 %v166_v48 }
 0x1c7   :  { %v265_v52 = vpop.f32.mrf.mxu1 }
 0x1c8   :  { %v287_v53 = vadd.f32 %v286_v51, %v265_v52 }
 0x1c9   :  { %v368_v54 = vpop.f32.mrf.mxu1 }
 0x1ca   :  { %289 = vst [vmem:[%s493_s5] sm:$0xff] %v287_v53 }
 0x1cb   :  { %v268_v55 = vpop.f32.mrf.mxu1 }
 0x1cc   :  { %v288_v56 = vadd.f32 %v286_v51, %v268_v55 }
 0x1cd   :  { %v369_v57 = vpop.f32.mrf.mxu1 }
 0x1ce   :  { %290 = vst [vmem:[%s493_s5 + $0x8] sm:$0xff] %v288_v56 }

</bundles_post_ra>
